<compile_context>
chip_gen: v7x
topology: tpu7x:2x2x1
jax: 0.10.0
libtpu: 0.0.40
codegen_flags: <defaults>
</compile_context>

<pallas_src>
import functools

import jax
import jax.numpy as jnp
from jax import lax
from jax.experimental import pallas as pl
from jax.experimental.pallas import tpu as pltpu

# Small synthetic sizes consistent with the module's forward (ntoken from vocab,
# ninp embedding dim, nhid GRU hidden).
NTOKEN = 64
NINP = 32
NHID = 32
GATE_W = 128        # fused gate width: 3*NHID = 96 padded to a full 128-lane vreg
NTOKEN_PAD = 128    # vocab padded to 128 lanes -> lane-dense (unmasked) stores
EPS = 1e-5          # nn.BatchNorm1d default eps
NEG_BIG = -1e30     # bias for padded vocab columns (never wins softmax/argmax)


def _round_up(x, m):
    return ((x + m - 1) // m) * m


# ----------------------------------------------------------------------------
# Encoder kernel: single-layer GRU over time (h0 = 0) followed by
# BatchNorm1d(affine=False) with batch statistics (training-mode forward).
# Input-gate projections for ALL timesteps are done as one fused matmul before
# the recurrence; only h @ W_hh remains on the serial critical path.
# ----------------------------------------------------------------------------
def encoder_kernel(emb_ref, wi_ref, wh_ref, bi_ref, bh_ref, hout_ref, gi_sc,
                   *, t_len):
    B, nh = hout_ref.shape
    bp = emb_ref.shape[0] // t_len          # padded batch (multiple of 8)

    # Hoisted, fused input-gate projections for every timestep: one big matmul.
    gi_sc[...] = (jnp.dot(emb_ref[...], wi_ref[...],
                          preferred_element_type=jnp.float32) + bi_ref[...])

    wh = wh_ref[...]
    bh = bh_ref[...]

    def step(t, h):
        start = pl.multiple_of(t * bp, bp)
        gi = gi_sc[pl.ds(start, bp), :]                       # (bp, GATE_W)
        gh = jnp.dot(h, wh, preferred_element_type=jnp.float32) + bh
        r = jax.nn.sigmoid(gi[:, :nh] + gh[:, :nh])
        z = jax.nn.sigmoid(gi[:, nh:2 * nh] + gh[:, nh:2 * nh])
        n = jnp.tanh(gi[:, 2 * nh:3 * nh] + r * gh[:, 2 * nh:3 * nh])
        return (1.0 - z) * n + z * h

    h = lax.fori_loop(0, t_len, step, jnp.zeros((bp, nh), jnp.float32))

    # BatchNorm1d(affine=False), training-mode batch statistics (biased var),
    # computed over the REAL batch rows only (padded rows discarded).
    hr = h[:B]
    mean = jnp.mean(hr, axis=0, keepdims=True)
    var = jnp.mean((hr - mean) ** 2, axis=0, keepdims=True)
    hout_ref[...] = (hr - mean) * lax.rsqrt(var + EPS)


# ----------------------------------------------------------------------------
# Decoder kernel: single invocation, in-kernel fori_loop over target positions.
# Carries (hidden, one-hot of previous greedy token) as loop values; the fed-back
# embedding lookup is one-hot @ embedding_table on the MXU.  The context term of
# the input gates (and the input bias) is loop-invariant and precomputed once.
# ----------------------------------------------------------------------------
def decoder_kernel(embtab_ref, ctx_ref, wie_ref, wic_ref, wh_ref,
                   bi_ref, bh_ref, wlin_ref, blin_ref, out_ref):
    t_len, bp, npad = out_ref.shape
    ntok = embtab_ref.shape[0]
    nh = wh_ref.shape[0]

    ctx = ctx_ref[...]
    embtab = embtab_ref[...]
    wie = wie_ref[...]
    wh = wh_ref[...]
    bh = bh_ref[...]
    wlin = wlin_ref[...]
    blin = blin_ref[...]

    # Loop-invariant: context contribution to the fused input gates (+ b_ih).
    gi_ctx = (jnp.dot(ctx, wic_ref[...], preferred_element_type=jnp.float32)
              + bi_ref[...])

    col_tok = lax.broadcasted_iota(jnp.int32, (bp, ntok), 1)
    col_out = lax.broadcasted_iota(jnp.int32, (bp, npad), 1)

    h0 = ctx                                       # hidden initialized to context
    oh0 = (col_tok == 0).astype(jnp.float32)       # first fed-back token id = 0

    def step(t, carry):
        h, oh = carry
        emb = jnp.dot(oh, embtab, preferred_element_type=jnp.float32)     # (bp, NINP)

        # GRUCell on concat([emb, context]); concat realized as split matmuls,
        # with the context half hoisted out of the loop (gi_ctx).
        gi = jnp.dot(emb, wie, preferred_element_type=jnp.float32) + gi_ctx
        gh = jnp.dot(h, wh, preferred_element_type=jnp.float32) + bh
        r = jax.nn.sigmoid(gi[:, :nh] + gh[:, :nh])
        z = jax.nn.sigmoid(gi[:, nh:2 * nh] + gh[:, nh:2 * nh])
        n = jnp.tanh(gi[:, 2 * nh:3 * nh] + r * gh[:, 2 * nh:3 * nh])
        hn = (1.0 - z) * n + z * h

        # Linear + LogSoftmax(dim=1) over the padded (lane-dense) vocab; padded
        # columns carry a -1e30 bias so they never affect lse or argmax.
        logits = jnp.dot(hn, wlin, preferred_element_type=jnp.float32) + blin
        m = jnp.max(logits, axis=1, keepdims=True)
        lse = m + jnp.log(jnp.sum(jnp.exp(logits - m), axis=1, keepdims=True))
        logp = logits - lse
        out_ref[t] = logp

        # Greedy argmax (first max index on ties) -> one-hot for next step.
        maxv = jnp.max(logp, axis=1, keepdims=True)
        idx = jnp.min(jnp.where(logp == maxv, col_out, npad),
                      axis=1, keepdims=True)
        oh_next = (col_tok == idx).astype(jnp.float32)
        return (hn, oh_next)

    lax.fori_loop(0, t_len, step, (h0, oh0))


# ----------------------------------------------------------------------------
# Parameter init (deterministic, PyTorch-default-like distributions).
# ----------------------------------------------------------------------------
def init_params(key):
    ks = jax.random.split(key, 12)
    s = 1.0 / jnp.sqrt(jnp.float32(NHID))
    u = lambda k, shape: jax.random.uniform(k, shape, jnp.float32, -s, s)
    return dict(
        enc_emb=jax.random.normal(ks[0], (NTOKEN, NINP), jnp.float32),
        enc_w_ih=u(ks[1], (3 * NHID, NINP)),
        enc_w_hh=u(ks[2], (3 * NHID, NHID)),
        enc_b_ih=u(ks[3], (3 * NHID,)),
        enc_b_hh=u(ks[4], (3 * NHID,)),
        dec_emb=jax.random.normal(ks[5], (NTOKEN, NINP), jnp.float32),
        dec_w_ih=u(ks[6], (3 * NHID, NINP + NHID)),
        dec_w_hh=u(ks[7], (3 * NHID, NHID)),
        dec_b_ih=u(ks[8], (3 * NHID,)),
        dec_b_hh=u(ks[9], (3 * NHID,)),
        lin_w=u(ks[10], (NTOKEN, NHID)),
        lin_b=u(ks[11], (NTOKEN,)),
    )


def _pad_gate_w(w):   # (3*NHID, K) -> (K, GATE_W)
    return jnp.pad(w.T, ((0, 0), (0, GATE_W - 3 * NHID)))


def _pad_gate_b(b):   # (3*NHID,) -> (1, GATE_W)
    return jnp.pad(b, (0, GATE_W - 3 * NHID)).reshape(1, GATE_W)


# ----------------------------------------------------------------------------
# Wrappers (glue: embedding gather for the encoder, fused-gate weight layout,
# batch / lane padding, output un-padding).
# ----------------------------------------------------------------------------
def encoder_forward(src_tokens, p):
    T, B = src_tokens.shape
    bp = _round_up(B, 8)

    emb = p['enc_emb'][src_tokens]                            # (T, B, NINP) gather (glue)
    emb = jnp.pad(emb, ((0, 0), (0, bp - B), (0, 0)))         # pad batch to 8 sublanes
    emb_flat = emb.reshape(T * bp, NINP)

    wi = _pad_gate_w(p['enc_w_ih'])                           # (NINP, 128)
    wh = _pad_gate_w(p['enc_w_hh'])                           # (NHID, 128)
    bi = _pad_gate_b(p['enc_b_ih'])
    bh = _pad_gate_b(p['enc_b_hh'])

    flops = 2 * T * bp * NINP * GATE_W + 2 * T * bp * NHID * GATE_W
    transc = T * bp * 3 * NHID
    bytes_acc = 4 * (emb_flat.size + wi.size + wh.size + bi.size + bh.size + B * NHID)

    return pl.pallas_call(
        functools.partial(encoder_kernel, t_len=T),
        out_shape=jax.ShapeDtypeStruct((B, NHID), jnp.float32),
        scratch_shapes=[pltpu.VMEM((T * bp, GATE_W), jnp.float32)],
        cost_estimate=pl.CostEstimate(flops=flops, transcendentals=transc,
                                      bytes_accessed=bytes_acc),
    )(emb_flat, wi, wh, bi, bh)


def decoder_forward(context, trg_len, p):
    B = context.shape[0]
    bp = _round_up(B, 8)
    ctx = jnp.pad(context, ((0, bp - B), (0, 0)))             # (bp, NHID)

    w_ih = p['dec_w_ih']                                      # (3*NHID, NINP + NHID)
    wie = _pad_gate_w(w_ih[:, :NINP])                         # (NINP, 128)  emb part
    wic = _pad_gate_w(w_ih[:, NINP:])                         # (NHID, 128)  ctx part
    wh = _pad_gate_w(p['dec_w_hh'])                           # (NHID, 128)
    bi = _pad_gate_b(p['dec_b_ih'])
    bh = _pad_gate_b(p['dec_b_hh'])
    wlin = jnp.pad(p['lin_w'].T, ((0, 0), (0, NTOKEN_PAD - NTOKEN)))   # (NHID, 128)
    blin = jnp.pad(p['lin_b'], (0, NTOKEN_PAD - NTOKEN),
                   constant_values=NEG_BIG).reshape(1, NTOKEN_PAD)

    flops = 2 * trg_len * bp * (NTOKEN * NINP + NINP * GATE_W
                                + NHID * GATE_W + NHID * NTOKEN_PAD)
    transc = trg_len * bp * (3 * NHID + NTOKEN_PAD)
    bytes_acc = 4 * (p['dec_emb'].size + ctx.size + wie.size + wic.size + wh.size
                     + bi.size + bh.size + wlin.size + blin.size
                     + trg_len * bp * NTOKEN_PAD)

    out_full = pl.pallas_call(
        decoder_kernel,
        out_shape=jax.ShapeDtypeStruct((trg_len, bp, NTOKEN_PAD), jnp.float32),
        cost_estimate=pl.CostEstimate(flops=flops, transcendentals=transc,
                                      bytes_accessed=bytes_acc),
    )(p['dec_emb'], ctx, wie, wic, wh, bi, bh, wlin, blin)

    # Un-pad batch / vocab (glue).
    return out_full[:, :B, :NTOKEN]


def seq2seq_forward(batch, p):
    # batch: (trg_len, cur_bs) int32 tokens
    context = encoder_forward(batch, p)              # (B, NHID); squeeze(0) is a no-op
    trg_len = batch.shape[0]
    outputs = decoder_forward(context, trg_len, p)   # (trg_len, B, NTOKEN) log-probs
    return outputs, context


# TODO(synk): at realistic sizes (NHID~1k, NTOKEN~32k) the decoder's vocab-sized
# linear/embedding must get a vocab-tiled grid (or pl.ANY + manual DMA) plus an
# online log-softmax to fit v7x's 64 MiB VMEM; not needed at these toy sizes.

if __name__ == "__main__":
    key = jax.random.PRNGKey(0)
    pkey, dkey = jax.random.split(key)
    params = init_params(pkey)

    T, B = 8, 4
    batch = jax.random.randint(dkey, (T, B), 0, NTOKEN, dtype=jnp.int32)

    outputs, context = jax.jit(seq2seq_forward)(batch, params)
    jax.block_until_ready((outputs, context))

    assert outputs.shape == (T, B, NTOKEN)
    assert context.shape == (B, NHID)
    assert bool(jnp.all(jnp.isfinite(outputs))) and bool(jnp.all(jnp.isfinite(context)))
    print("KERNEL_OK")
</pallas_src>

<mosaic_0001>
module attributes {stable_mosaic.version = 11 : i64} {
  func.func @encoder_kernel(%arg0: memref<64x32xf32, #tpu.memory_space<vmem>>, %arg1: memref<32x128xf32, #tpu.memory_space<vmem>>, %arg2: memref<32x128xf32, #tpu.memory_space<vmem>>, %arg3: memref<1x128xf32, #tpu.memory_space<vmem>>, %arg4: memref<1x128xf32, #tpu.memory_space<vmem>>, %arg5: memref<4x32xf32, #tpu.memory_space<vmem>>, %arg6: memref<64x128xf32, #tpu.memory_space<vmem>>) attributes {dimension_semantics = [], scalar_prefetch = 0 : i64, scratch_operands = 1 : i64, tpu.core_type = #tpu.core_type<tc>} {
    %c0 = arith.constant 0 : index
    %c0_0 = arith.constant 0 : index
    %0 = vector.load %arg0[%c0, %c0_0] : memref<64x32xf32, #tpu.memory_space<vmem>>, vector<64x32xf32>
    %c0_1 = arith.constant 0 : index
    %c0_2 = arith.constant 0 : index
    %1 = vector.load %arg1[%c0_1, %c0_2] : memref<32x128xf32, #tpu.memory_space<vmem>>, vector<32x128xf32>
    %cst = arith.constant dense<0.000000e+00> : vector<64x128xf32>
    %2 = tpu.matmul %0, %1, %cst {dimension_numbers = #tpu.dot_dimension_numbers<[1], [0], [0], [1], [0, 0, 1, 1], [], []>} : vector<64x32xf32>, vector<32x128xf32>, vector<64x128xf32> -> vector<64x128xf32>
    %c0_3 = arith.constant 0 : index
    %c0_4 = arith.constant 0 : index
    %3 = vector.load %arg3[%c0_3, %c0_4] : memref<1x128xf32, #tpu.memory_space<vmem>>, vector<1x128xf32>
    %4 = vector.broadcast %3 : vector<1x128xf32> to vector<64x128xf32>
    %5 = arith.addf %2, %4 : vector<64x128xf32>
    %c0_5 = arith.constant 0 : index
    %c0_6 = arith.constant 0 : index
    %6 = vector.load %arg6[%c0_5, %c0_6] : memref<64x128xf32, #tpu.memory_space<vmem>>, vector<64x128xf32>
    tpu.vector_store %arg6[%c0_5, %c0_6], %5 {strides = array<i32>} : memref<64x128xf32, #tpu.memory_space<vmem>>, vector<64x128xf32>,
    %c0_7 = arith.constant 0 : index
    %c0_8 = arith.constant 0 : index
    %7 = vector.load %arg2[%c0_7, %c0_8] : memref<32x128xf32, #tpu.memory_space<vmem>>, vector<32x128xf32>
    %c0_9 = arith.constant 0 : index
    %c0_10 = arith.constant 0 : index
    %8 = vector.load %arg4[%c0_9, %c0_10] : memref<1x128xf32, #tpu.memory_space<vmem>>, vector<1x128xf32>
    %cst_11 = arith.constant 0.000000e+00 : f32
    %9 = vector.broadcast %cst_11 : f32 to vector<8x32xf32>
    %c0_i32 = arith.constant 0 : i32
    %c8_i32 = arith.constant 8 : i32
    %10 = arith.addi %c0_i32, %c8_i32 : i32
    %c1_i32 = arith.constant 1 : i32
    %11 = scf.for %arg7 = %c0_i32 to %10 step %c1_i32 iter_args(%arg8 = %9) -> (vector<8x32xf32>)  : i32 {
      %c8_i32_20 = arith.constant 8 : i32
      %32 = arith.muli %arg7, %c8_i32_20 : i32
      %33 = tpu.assume_multiple %32, 8 : i32
      %34 = arith.index_cast %33 : i32 to index
      %c0_21 = arith.constant 0 : index
      %35 = vector.load %arg6[%34, %c0_21] : memref<64x128xf32, #tpu.memory_space<vmem>>, vector<8x128xf32>
      %cst_22 = arith.constant dense<0.000000e+00> : vector<8x128xf32>
      %36 = tpu.matmul %arg8, %7, %cst_22 {dimension_numbers = #tpu.dot_dimension_numbers<[1], [0], [0], [1], [0, 0, 1, 1], [], []>} : vector<8x32xf32>, vector<32x128xf32>, vector<8x128xf32> -> vector<8x128xf32>
      %37 = vector.broadcast %8 : vector<1x128xf32> to vector<8x128xf32>
      %38 = arith.addf %36, %37 : vector<8x128xf32>
      %39 = vector.extract_strided_slice %35 {offsets = [0, 0], sizes = [8, 32], strides = [1, 1]} : vector<8x128xf32> to vector<8x32xf32>
      %40 = vector.extract_strided_slice %38 {offsets = [0, 0], sizes = [8, 32], strides = [1, 1]} : vector<8x128xf32> to vector<8x32xf32>
      %41 = arith.addf %39, %40 : vector<8x32xf32>
      %42 = arith.negf %41 : vector<8x32xf32>
      %43 = math.exp %42 : vector<8x32xf32>
      %cst_23 = arith.constant 1.000000e+00 : f32
      %44 = vector.broadcast %cst_23 : f32 to vector<8x32xf32>
      %45 = arith.addf %44, %43 : vector<8x32xf32>
      %46 = arith.divf %44, %45 : vector<8x32xf32>
      %47 = vector.extract_strided_slice %35 {offsets = [0, 32], sizes = [8, 32], strides = [1, 1]} : vector<8x128xf32> to vector<8x32xf32>
      %48 = vector.extract_strided_slice %38 {offsets = [0, 32], sizes = [8, 32], strides = [1, 1]} : vector<8x128xf32> to vector<8x32xf32>
      %49 = arith.addf %47, %48 : vector<8x32xf32>
      %50 = arith.negf %49 : vector<8x32xf32>
      %51 = math.exp %50 : vector<8x32xf32>
      %cst_24 = arith.constant 1.000000e+00 : f32
      %52 = vector.broadcast %cst_24 : f32 to vector<8x32xf32>
      %53 = arith.addf %52, %51 : vector<8x32xf32>
      %54 = arith.divf %52, %53 : vector<8x32xf32>
      %55 = vector.extract_strided_slice %35 {offsets = [0, 64], sizes = [8, 32], strides = [1, 1]} : vector<8x128xf32> to vector<8x32xf32>
      %56 = vector.extract_strided_slice %38 {offsets = [0, 64], sizes = [8, 32], strides = [1, 1]} : vector<8x128xf32> to vector<8x32xf32>
      %57 = arith.mulf %46, %56 : vector<8x32xf32>
      %58 = arith.addf %55, %57 : vector<8x32xf32>
      %59 = math.tanh %58 : vector<8x32xf32>
      %cst_25 = arith.constant 1.000000e+00 : f32
      %60 = vector.broadcast %cst_25 : f32 to vector<8x32xf32>
      %61 = arith.subf %60, %54 : vector<8x32xf32>
      %62 = arith.mulf %61, %59 : vector<8x32xf32>
      %63 = arith.mulf %54, %arg8 : vector<8x32xf32>
      %64 = arith.addf %62, %63 : vector<8x32xf32>
      scf.yield %64 : vector<8x32xf32>
    }
    %c8_i32_12 = arith.constant 8 : i32
    %12 = vector.extract_strided_slice %11 {offsets = [0, 0], sizes = [4, 32], strides = [1, 1]} : vector<8x32xf32> to vector<4x32xf32>
    %cst_13 = arith.constant dense<0.000000e+00> : vector<32xf32>
    %13 = vector.multi_reduction <add>, %12, %cst_13 [0] : vector<4x32xf32> to vector<32xf32>
    %14 = vector.shape_cast %13 : vector<32xf32> to vector<1x32xf32>
    %cst_14 = arith.constant 4.000000e+00 : f32
    %15 = vector.broadcast %cst_14 : f32 to vector<1x32xf32>
    %16 = arith.divf %14, %15 : vector<1x32xf32>
    %17 = vector.broadcast %16 : vector<1x32xf32> to vector<4x32xf32>
    %18 = arith.subf %12, %17 : vector<4x32xf32>
    %19 = arith.mulf %18, %18 : vector<4x32xf32>
    %cst_15 = arith.constant dense<0.000000e+00> : vector<32xf32>
    %20 = vector.multi_reduction <add>, %19, %cst_15 [0] : vector<4x32xf32> to vector<32xf32>
    %21 = vector.shape_cast %20 : vector<32xf32> to vector<1x32xf32>
    %cst_16 = arith.constant 4.000000e+00 : f32
    %22 = vector.broadcast %cst_16 : f32 to vector<1x32xf32>
    %23 = arith.divf %21, %22 : vector<1x32xf32>
    %24 = vector.broadcast %16 : vector<1x32xf32> to vector<4x32xf32>
    %25 = arith.subf %12, %24 : vector<4x32xf32>
    %cst_17 = arith.constant 9.99999974E-6 : f32
    %26 = vector.broadcast %cst_17 : f32 to vector<1x32xf32>
    %27 = arith.addf %23, %26 : vector<1x32xf32>
    %28 = math.rsqrt %27 : vector<1x32xf32>
    %29 = vector.broadcast %28 : vector<1x32xf32> to vector<4x32xf32>
    %30 = arith.mulf %25, %29 : vector<4x32xf32>
    %c0_18 = arith.constant 0 : index
    %c0_19 = arith.constant 0 : index
    %31 = vector.load %arg5[%c0_18, %c0_19] : memref<4x32xf32, #tpu.memory_space<vmem>>, vector<4x32xf32>
    tpu.vector_store %arg5[%c0_18, %c0_19], %30 {strides = array<i32>} : memref<4x32xf32, #tpu.memory_space<vmem>>, vector<4x32xf32>,
    return
  }
}

module attributes {stable_mosaic.version = 11 : i64} {
  func.func @decoder_kernel(%arg0: memref<64x32xf32, #tpu.memory_space<vmem>>, %arg1: memref<8x32xf32, #tpu.memory_space<vmem>>, %arg2: memref<32x128xf32, #tpu.memory_space<vmem>>, %arg3: memref<32x128xf32, #tpu.memory_space<vmem>>, %arg4: memref<32x128xf32, #tpu.memory_space<vmem>>, %arg5: memref<1x128xf32, #tpu.memory_space<vmem>>, %arg6: memref<1x128xf32, #tpu.memory_space<vmem>>, %arg7: memref<32x128xf32, #tpu.memory_space<vmem>>, %arg8: memref<1x128xf32, #tpu.memory_space<vmem>>, %arg9: memref<8x8x128xf32, #tpu.memory_space<vmem>>) attributes {dimension_semantics = [], scalar_prefetch = 0 : i64, scratch_operands = 0 : i64, tpu.core_type = #tpu.core_type<tc>} {
    %c0 = arith.constant 0 : index
    %c0_0 = arith.constant 0 : index
    %0 = vector.load %arg1[%c0, %c0_0] : memref<8x32xf32, #tpu.memory_space<vmem>>, vector<8x32xf32>
    %c0_1 = arith.constant 0 : index
    %c0_2 = arith.constant 0 : index
    %1 = vector.load %arg0[%c0_1, %c0_2] : memref<64x32xf32, #tpu.memory_space<vmem>>, vector<64x32xf32>
    %c0_3 = arith.constant 0 : index
    %c0_4 = arith.constant 0 : index
    %2 = vector.load %arg2[%c0_3, %c0_4] : memref<32x128xf32, #tpu.memory_space<vmem>>, vector<32x128xf32>
    %c0_5 = arith.constant 0 : index
    %c0_6 = arith.constant 0 : index
    %3 = vector.load %arg4[%c0_5, %c0_6] : memref<32x128xf32, #tpu.memory_space<vmem>>, vector<32x128xf32>
    %c0_7 = arith.constant 0 : index
    %c0_8 = arith.constant 0 : index
    %4 = vector.load %arg6[%c0_7, %c0_8] : memref<1x128xf32, #tpu.memory_space<vmem>>, vector<1x128xf32>
    %c0_9 = arith.constant 0 : index
    %c0_10 = arith.constant 0 : index
    %5 = vector.load %arg7[%c0_9, %c0_10] : memref<32x128xf32, #tpu.memory_space<vmem>>, vector<32x128xf32>
    %c0_11 = arith.constant 0 : index
    %c0_12 = arith.constant 0 : index
    %6 = vector.load %arg8[%c0_11, %c0_12] : memref<1x128xf32, #tpu.memory_space<vmem>>, vector<1x128xf32>
    %c0_13 = arith.constant 0 : index
    %c0_14 = arith.constant 0 : index
    %7 = vector.load %arg3[%c0_13, %c0_14] : memref<32x128xf32, #tpu.memory_space<vmem>>, vector<32x128xf32>
    %cst = arith.constant dense<0.000000e+00> : vector<8x128xf32>
    %8 = tpu.matmul %0, %7, %cst {dimension_numbers = #tpu.dot_dimension_numbers<[1], [0], [0], [1], [0, 0, 1, 1], [], []>} : vector<8x32xf32>, vector<32x128xf32>, vector<8x128xf32> -> vector<8x128xf32>
    %c0_15 = arith.constant 0 : index
    %c0_16 = arith.constant 0 : index
    %9 = vector.load %arg5[%c0_15, %c0_16] : memref<1x128xf32, #tpu.memory_space<vmem>>, vector<1x128xf32>
    %10 = vector.broadcast %9 : vector<1x128xf32> to vector<8x128xf32>
    %11 = arith.addf %8, %10 : vector<8x128xf32>
    %12 = tpu.iota {dimensions = array<i32: 1>} : vector<8x64xi32>
    %13 = tpu.iota {dimensions = array<i32: 1>} : vector<8x128xi32>
    %c0_i32 = arith.constant 0 : i32
    %14 = vector.broadcast %c0_i32 : i32 to vector<8x64xi32>
    %15 = arith.cmpi eq, %12, %14 : vector<8x64xi32>
    %16 = arith.extui %15 : vector<8x64xi1> to vector<8x64xi32>
    %17 = arith.sitofp %16 : vector<8x64xi32> to vector<8x64xf32>
    %c0_i32_17 = arith.constant 0 : i32
    %c8_i32 = arith.constant 8 : i32
    %18 = arith.addi %c0_i32_17, %c8_i32 : i32
    %c1_i32 = arith.constant 1 : i32
    %19:2 = scf.for %arg10 = %c0_i32_17 to %18 step %c1_i32 iter_args(%arg11 = %0, %arg12 = %17) -> (vector<8x32xf32>, vector<8x64xf32>)  : i32 {
      %cst_19 = arith.constant dense<0.000000e+00> : vector<8x32xf32>
      %20 = tpu.matmul %arg12, %1, %cst_19 {dimension_numbers = #tpu.dot_dimension_numbers<[1], [0], [0], [1], [0, 0, 1, 1], [], []>} : vector<8x64xf32>, vector<64x32xf32>, vector<8x32xf32> -> vector<8x32xf32>
      %cst_20 = arith.constant dense<0.000000e+00> : vector<8x128xf32>
      %21 = tpu.matmul %20, %2, %cst_20 {dimension_numbers = #tpu.dot_dimension_numbers<[1], [0], [0], [1], [0, 0, 1, 1], [], []>} : vector<8x32xf32>, vector<32x128xf32>, vector<8x128xf32> -> vector<8x128xf32>
      %22 = arith.addf %21, %11 : vector<8x128xf32>
      %cst_21 = arith.constant dense<0.000000e+00> : vector<8x128xf32>
      %23 = tpu.matmul %arg11, %3, %cst_21 {dimension_numbers = #tpu.dot_dimension_numbers<[1], [0], [0], [1], [0, 0, 1, 1], [], []>} : vector<8x32xf32>, vector<32x128xf32>, vector<8x128xf32> -> vector<8x128xf32>
      %24 = vector.broadcast %4 : vector<1x128xf32> to vector<8x128xf32>
      %25 = arith.addf %23, %24 : vector<8x128xf32>
      %26 = vector.extract_strided_slice %22 {offsets = [0, 0], sizes = [8, 32], strides = [1, 1]} : vector<8x128xf32> to vector<8x32xf32>
      %27 = vector.extract_strided_slice %25 {offsets = [0, 0], sizes = [8, 32], strides = [1, 1]} : vector<8x128xf32> to vector<8x32xf32>
      %28 = arith.addf %26, %27 : vector<8x32xf32>
      %29 = arith.negf %28 : vector<8x32xf32>
      %30 = math.exp %29 : vector<8x32xf32>
      %cst_22 = arith.constant 1.000000e+00 : f32
      %31 = vector.broadcast %cst_22 : f32 to vector<8x32xf32>
      %32 = arith.addf %31, %30 : vector<8x32xf32>
      %33 = arith.divf %31, %32 : vector<8x32xf32>
      %34 = vector.extract_strided_slice %22 {offsets = [0, 32], sizes = [8, 32], strides = [1, 1]} : vector<8x128xf32> to vector<8x32xf32>
      %35 = vector.extract_strided_slice %25 {offsets = [0, 32], sizes = [8, 32], strides = [1, 1]} : vector<8x128xf32> to vector<8x32xf32>
      %36 = arith.addf %34, %35 : vector<8x32xf32>
      %37 = arith.negf %36 : vector<8x32xf32>
      %38 = math.exp %37 : vector<8x32xf32>
      %cst_23 = arith.constant 1.000000e+00 : f32
      %39 = vector.broadcast %cst_23 : f32 to vector<8x32xf32>
      %40 = arith.addf %39, %38 : vector<8x32xf32>
      %41 = arith.divf %39, %40 : vector<8x32xf32>
      %42 = vector.extract_strided_slice %22 {offsets = [0, 64], sizes = [8, 32], strides = [1, 1]} : vector<8x128xf32> to vector<8x32xf32>
      %43 = vector.extract_strided_slice %25 {offsets = [0, 64], sizes = [8, 32], strides = [1, 1]} : vector<8x128xf32> to vector<8x32xf32>
      %44 = arith.mulf %33, %43 : vector<8x32xf32>
      %45 = arith.addf %42, %44 : vector<8x32xf32>
      %46 = math.tanh %45 : vector<8x32xf32>
      %cst_24 = arith.constant 1.000000e+00 : f32
      %47 = vector.broadcast %cst_24 : f32 to vector<8x32xf32>
      %48 = arith.subf %47, %41 : vector<8x32xf32>
      %49 = arith.mulf %48, %46 : vector<8x32xf32>
      %50 = arith.mulf %41, %arg11 : vector<8x32xf32>
      %51 = arith.addf %49, %50 : vector<8x32xf32>
      %cst_25 = arith.constant dense<0.000000e+00> : vector<8x128xf32>
      %52 = tpu.matmul %51, %5, %cst_25 {dimension_numbers = #tpu.dot_dimension_numbers<[1], [0], [0], [1], [0, 0, 1, 1], [], []>} : vector<8x32xf32>, vector<32x128xf32>, vector<8x128xf32> -> vector<8x128xf32>
      %53 = vector.broadcast %6 : vector<1x128xf32> to vector<8x128xf32>
      %54 = arith.addf %52, %53 : vector<8x128xf32>
      %cst_26 = arith.constant dense<0xFF800000> : vector<8xf32>
      %55 = vector.multi_reduction <maximumf>, %54, %cst_26 [1] : vector<8x128xf32> to vector<8xf32>
      %56 = vector.shape_cast %55 : vector<8xf32> to vector<8x1xf32>
      %57 = vector.broadcast %56 : vector<8x1xf32> to vector<8x128xf32>
      %58 = arith.subf %54, %57 : vector<8x128xf32>
      %59 = math.exp %58 : vector<8x128xf32>
      %cst_27 = arith.constant dense<0.000000e+00> : vector<8xf32>
      %60 = vector.multi_reduction <add>, %59, %cst_27 [1] : vector<8x128xf32> to vector<8xf32>
      %61 = vector.shape_cast %60 : vector<8xf32> to vector<8x1xf32>
      %62 = math.log %61 : vector<8x1xf32>
      %63 = arith.addf %56, %62 : vector<8x1xf32>
      %64 = vector.broadcast %63 : vector<8x1xf32> to vector<8x128xf32>
      %65 = arith.subf %54, %64 : vector<8x128xf32>
      %66 = arith.index_cast %arg10 : i32 to index
      %c0_28 = arith.constant 0 : index
      %c0_29 = arith.constant 0 : index
      %67 = vector.load %arg9[%66, %c0_28, %c0_29] : memref<8x8x128xf32, #tpu.memory_space<vmem>>, vector<1x8x128xf32>
      %68 = vector.shape_cast %67 : vector<1x8x128xf32> to vector<8x128xf32>
      %69 = vector.shape_cast %65 : vector<8x128xf32> to vector<1x8x128xf32>
      tpu.vector_store %arg9[%66, %c0_28, %c0_29], %69 {strides = array<i32>} : memref<8x8x128xf32, #tpu.memory_space<vmem>>, vector<1x8x128xf32>,
      %cst_30 = arith.constant dense<0xFF800000> : vector<8xf32>
      %70 = vector.multi_reduction <maximumf>, %65, %cst_30 [1] : vector<8x128xf32> to vector<8xf32>
      %71 = vector.shape_cast %70 : vector<8xf32> to vector<8x1xf32>
      %72 = vector.broadcast %71 : vector<8x1xf32> to vector<8x128xf32>
      %73 = arith.cmpf oeq, %65, %72 : vector<8x128xf32>
      %c128_i32 = arith.constant 128 : i32
      %74 = vector.broadcast %c128_i32 : i32 to vector<8x128xi32>
      %75 = arith.select %73, %13, %74 : vector<8x128xi1>, vector<8x128xi32>
      %cst_31 = arith.constant dense<2147483647> : vector<8xi32>
      %76 = vector.multi_reduction <minsi>, %75, %cst_31 [1] : vector<8x128xi32> to vector<8xi32>
      %77 = vector.shape_cast %76 : vector<8xi32> to vector<8x1xi32>
      %78 = vector.broadcast %77 : vector<8x1xi32> to vector<8x64xi32>
      %79 = arith.cmpi eq, %12, %78 : vector<8x64xi32>
      %80 = arith.extui %79 : vector<8x64xi1> to vector<8x64xi32>
      %81 = arith.sitofp %80 : vector<8x64xi32> to vector<8x64xf32>
      scf.yield %51, %81 : vector<8x32xf32>, vector<8x64xf32>
    }
    %c8_i32_18 = arith.constant 8 : i32
    return
  }
}

</mosaic_0001>

<bundles_post_ra>
// kernel: seq2seq_forward.2
= control target key start
LH: loop header
LB: loop body
LE: loop exit
PB: predicated region body
PF: predicated region fallthrough
CT: control target
= control target key end

     0   :  { %vm39_vm0 = vcmask 261120   ;;  %v459_v36 = vmov 0.0   ;;  %s595_s1 = inlined_call_operand.vmem [shape: f32[32,128], index: 1, kind: input, shape index: {}]   ;;  %s596_s5 = inlined_call_operand.vmem [shape: f32[4,32], index: 5, kind: output, shape index: {}]   ;;  %s597_s0 = inlined_call_operand.vmem [shape: f32[64,32], index: 0, kind: input, shape index: {}]   ;;  %s598_s2 = inlined_call_operand.vmem [shape: f32[32,128], index: 2, kind: input, shape index: {}]   ;;  %s599_s4 = inlined_call_operand.vmem [shape: f32[1,128], index: 4, kind: input, shape index: {}]   ;;  %s600_s3 = inlined_call_operand.vmem [shape: f32[1,128], index: 3, kind: input, shape index: {}]  }
   0x1   :  { %v28_v0 = vld [vmem:[%s595_s1] sm:$0xff]  ;;  %v29_v1 = vld [vmem:[%s595_s1 + $0x8] sm:$0xff]  ;;  %v30_v2 = vld [vmem:[%s595_s1 + $0x10] sm:$0xff] }
   0x2   :  { %v403_v3 = vpack.c.bf16 %v29_v1, %v28_v0  ;;  %v31_v4 = vld [vmem:[%s595_s1 + $0x18] sm:$0xff]  ;;  %v20_v5 = vld [vmem:[%s597_s0] sm:$0xff]  ;;  %v21_v8 = vld [vmem:[%s597_s0 + $0x8] sm:$0xff] }
   0x3   :  { %v24_v6 = vld [vmem:[%s597_s0 + $0x20] sm:$0xff]  ;;  %v407_v7 = vpack.c.bf16 %v31_v4, %v30_v2  ;;  %380 = vmatprep.mubr.msk.f32.mxu0 %vm39_vm0, %v20_v5  ;;  %v25_v9 = vld [vmem:[%s597_s0 + $0x28] sm:$0xff]  ;;  %v22_v10 = vld [vmem:[%s597_s0 + $0x10] sm:$0xff] }
   0x4   :  { %386 = vmatprep.mubr.msk.f32.mxu1 %vm39_vm0, %v24_v6  ;;  %404 = vmatprep.subr.bf16.mxu0 %v403_v3  ;;  %v26_v11 = vld [vmem:[%s597_s0 + $0x30] sm:$0xff]  ;;  %v23_v12 = vld [vmem:[%s597_s0 + $0x18] sm:$0xff]  ;;  %v550_v14 = vld [vmem:[%s598_s2] sm:$0xff] }
   0x5   :  { %417 = vmatprep.subr.bf16.mxu1 %v403_v3  ;;  %406 = vmatpush3.bf16.msra.mxu0 %v403_v3  ;;  %v27_v13 = vld [vmem:[%s597_s0 + $0x38] sm:$0xff]  ;;  %v555_v15 = vld [vmem:[%s598_s2 + $0x8] sm:$0xff]  ;;  %v560_v16 = vld [vmem:[%s598_s2 + $0x10] sm:$0xff] }
   0x6   :  { %419 = vmatpush3.bf16.msra.mxu1 %v403_v3  ;;  %408 = vmatprep.subr.bf16.mxu0 %v407_v7  ;;  %v565_v17 = vld [vmem:[%s598_s2 + $0x18] sm:$0xff]  ;;  %v570_v18 = vld [vmem:[%s599_s4] ss:$0 sm:$0xff]  ;;  %s575_s2 = smov 0  }
   0x7   :  { %418 = vmatprep.subr.bf16.mxu1 %v407_v7  ;;  %v342_v19 = vld [vmem:[%s600_s3] ss:$0 sm:$0xff] }
   0x9   :  { %410 = vmatpush3.bf16.msra.mxu0 %v407_v7 }
   0xa   :  { %420 = vmatpush3.bf16.msra.mxu1 %v407_v7 }
   0xc   :  { %381 = vmatmul.mubr.msk.f32.vlgmr.msra.gmra.mrb[0].mxu0 %vm39_vm0, %v21_v8 }
   0xd   :  { %387 = vmatmul.mubr.msk.f32.vlgmr.msra.gmra.mrb[0].mxu1 %vm39_vm0, %v25_v9  ;;  %383 = vmatprep.mubr.msk.f32.mxu0 %vm39_vm0, %v22_v10 }
   0xe   :  { %389 = vmatprep.mubr.msk.f32.mxu1 %vm39_vm0, %v26_v11 }
  0x10   :  { %384 = vmatmul.mubr.msk.f32.gmra.mrb[2].mxu0 %vm39_vm0, %v23_v12 }
  0x11   :  { %390 = vmatmul.mubr.msk.f32.gmra.mrb[2].mxu1 %vm39_vm0, %v27_v13 }
  0xdf   :  { %v382_v20 = vpop.f32.mrb[0].mxu0 }
  0xe0   :  { %v388_v21 = vpop.f32.mrb[0].mxu1  ;;  %v136_v22 = vadd.f32 %v382_v20, %v342_v19  ;;  %v130_v24 = vpop.f32.mrb[1].mxu0 }
  0xe1   :  { %v156_v23 = vadd.f32 %v388_v21, %v342_v19  ;;  %v150_v25 = vpop.f32.mrb[1].mxu1  ;;  %v131_v26 = vadd.f32 %v342_v19, %v130_v24 }
  0xe2   :  { %v151_v27 = vadd.f32 %v342_v19, %v150_v25  ;;  %170 = vst [vmem:[#allocation2 + $0x8] sm:$0xff] %v136_v22 }
  0xe3   :  { %174 = vst [vmem:[#allocation2 + $0x28] sm:$0xff] %v156_v23  ;;  %169 = vst [vmem:[#allocation2] sm:$0xff] %v131_v26  ;;  %v385_v28 = vpop.f32.mrb[2].mxu0 }
  0xe4   :  { %173 = vst [vmem:[#allocation2 + $0x20] sm:$0xff] %v151_v27  ;;  %v391_v29 = vpop.f32.mrb[2].mxu1  ;;  %v146_v30 = vadd.f32 %v385_v28, %v342_v19  ;;  %v140_v32 = vpop.f32.mrb[3].mxu0 }
  0xe5   :  { %v166_v31 = vadd.f32 %v391_v29, %v342_v19  ;;  %v160_v33 = vpop.f32.mrb[3].mxu1  ;;  %v141_v34 = vadd.f32 %v342_v19, %v140_v32 }
  0xe6   :  { %v161_v35 = vadd.f32 %v342_v19, %v160_v33  ;;  %172 = vst [vmem:[#allocation2 + $0x18] sm:$0xff] %v146_v30 }
  0xe7   :  { %176 = vst [vmem:[#allocation2 + $0x38] sm:$0xff] %v166_v31  ;;  %171 = vst [vmem:[#allocation2 + $0x10] sm:$0xff] %v141_v34 }
  0xe8   :  { %175 = vst [vmem:[#allocation2 + $0x30] sm:$0xff] %v161_v35 }
  0xe9 LB: > { %v412_v37 = vpack.c.bf16 %v555_v15, %v550_v14  ;;  %v467_v38 = vmov 0.0|0.0   ;;  %s468_s3 = smov 96   ;;  %v415_v39 = vpack.c.bf16 %v565_v17, %v560_v16  ;;  %vm469_vm1 = vmmov 0   ;;  %s471_s4 = smov 64   ;;  %s465_s2 = sphi %s575_s2, %s187_s2   ;;  %v461_v36 = vphi %v459_v36, %v460_v36  }
  0xea   : > { %411 = vmatprep.subr.bf16.mxu0 %v467_v38  ;;  %199 = vrot.lane.b32.xlu0 %v461_v36, %s468_s3  ;;  %v470_v40 = vmov 0.0   ;;  %s351_s27 = sshll.u32 %s465_s2, 3  ;;  %s187_s2 = sadd.s32 1, %s465_s2  }
  0xeb   : > { %413 = vmatpush3.bf16.msra.mxu0 %v412_v37  ;;  %400 = vmatprep.mubr.msk.f32.mxu0 %vm469_vm1, %v470_v40  ;;  %s190_s28 = scalar_lea.vmem [#allocation2], %s351_s27  ;;  %p184_p0 = scmp.ge.s32.totalorder %s187_s2, 8  }
  0xec   : > { %414 = vmatprep.subr.bf16.mxu0 %v467_v38  ;;  %vm299_vm2 = vcmask (%p184_p0), 519424   ;;  %s472_s29 = smov (%p184_p0), 96   ;;  %vm326_vm3 = vcmask (%p184_p0), 257024  }
  0xef   : > { %416 = vmatpush3.bf16.msra.mxu0 %v415_v39  ;;  %v191_v45 = vld [vmem:[%s190_s28] sm:$0xff] }
 0x15c   : > { %v200_v41 = vpop.permute.xlu0 %199 }
 0x15d   : > { %401 = vmatmul.mubr.msk.f32.vlgmr.msra.gmra.mrb[0].mxu0 %vm39_vm0, %v200_v41 }
 0x230   : > { %v269_v42 = vpop.f32.mrb[0].mxu0 }
 0x231   : > { %v270_v43 = vadd.f32 %v570_v18, %v269_v42  ;;  %v402_v44 = vpop.f32.mrb[1].mxu0 }
 0x233   : > { %281 = vrot.lane.b32.xlu0 %v270_v43, %s471_s4  ;;  %v273_v46 = vadd.f32 %v270_v43, %v191_v45 }
 0x235   : > { %v354_v47 = vmul.f32 -1.442695, %v273_v46 }
 0x237   : > { %443 = vpow2.f32 %v354_v47 }
 0x241   : > { %v444_v48 = vpop.eup %443 }
 0x242   : > { %v277_v49 = vadd.f32 1.0, %v444_v48 }
 0x244   : > { %445 = vrcp.f32 %v277_v49 }
 0x24e   : > { %v446_v50 = vpop.eup %445 }
 0x24f   : > { %v291_v56 = vsub.f32 1.0, %v446_v50  ;;  %v297_v58 = vmul.f32 %v461_v36, %v446_v50 }
 0x2a5   : > { %v282_v51 = vpop.permute.xlu0 %281 }
 0x2a6   : > { %v284_v52 = vmul.f32 %v446_v50, %v282_v51 }
 0x2a8   : > { %286 = vrot.lane.b32.xlu1 %v284_v52, %s471_s4 }
 0x31a   : > { %v287_v53 = vpop.permute.xlu1 %286 }
 0x31b   : > { %v289_v54 = vadd.f32 %v287_v53, %v191_v45 }
 0x31d   : > { %447 = vtanh.f32 %v289_v54 }
 0x327   : > { %v448_v55 = vpop.eup %447 }
 0x328   : > { %293 = vrot.lane.b32.xlu1 %v448_v55, %s468_s3 }
 0x399   :  { %186 = sbr.rel (!%p184_p0) target bundleno = 233 (0xe9), region = 48 }
 0x39a   : > { %v294_v57 = vpop.permute.xlu1 %293 }
 0x39b   : > { %v296_v59 = vmul.f32 %v294_v57, %v291_v56 }
 0x39d   : > { %v298_v60 = vadd.f32 %v297_v58, %v296_v59  }
 0x39f   : > { %v460_v36 = vmov %v298_v60   ;;  %v300_v61 = vsel (%p184_p0), %vm299_vm2, %v298_v60, 0.0 }
 0x3a0   :  { %v301_v62 = vrot.slane %v300_v61, 4 }
 0x3a2   :  { %v302_v63 = vadd.f32 %v301_v62, %v300_v61 }
 0x3a4   :  { %v303_v0 = vrot.slane %v302_v63, 2 }
 0x3a6   :  { %v304_v1 = vadd.f32 %v303_v0, %v302_v63 }
 0x3a8   :  { %v305_v2 = vrot.slane %v304_v1, 1 }
 0x3aa   :  { %v306_v3 = vadd.f32 %v305_v2, %v304_v1 }
 0x3ac   :  { %v308_v4 = vmul.f32 0.25, %v306_v3 }
 0x3ae   :  { %v309_v5 = vsub.f32 %v298_v60, %v308_v4 }
 0x3b0   :  { %v310_v6 = vmul.f32 %v309_v5, %v309_v5 }
 0x3b2   :  { %v311_v7 = vsel %vm299_vm2, %v310_v6, 0.0 }
 0x3b3   :  { %v312_v8 = vrot.slane %v311_v7, 4 }
 0x3b5   :  { %v313_v9 = vadd.f32 %v312_v8, %v311_v7 }
 0x3b7   :  { %v314_v10 = vrot.slane %v313_v9, 2 }
 0x3b9   :  { %v315_v11 = vadd.f32 %v314_v10, %v313_v9 }
 0x3bb   :  { %v316_v12 = vrot.slane %v315_v11, 1 }
 0x3bd   :  { %v317_v13 = vadd.f32 %v316_v12, %v315_v11 }
 0x3bf   :  { %v318_v19 = vmul.f32 0.25, %v317_v13 }
 0x3c1   :  { %v319_v20 = vadd.f32 1e-05, %v318_v19 }
 0x3c3   :  { %449 = vrsqrt.f32 %v319_v20 }
 0x3cd   :  { %v450_v14 = vpop.eup %449 }
 0x3ce   :  { %v321_v15 = vmul.f32 %v450_v14, %v309_v5 }
 0x3d0   :  { %323 = vrot.lane.b32.xlu0 %v321_v15, %s472_s29 }
 0x442   :  { %v324_v16 = vpop.permute.xlu0 %323 }
 0x443   :  { %327 = vst.msk [vmem:[%s596_s5] sm:$0xf] %vm326_vm3, %v324_v16 }

// kernel: seq2seq_forward.3
= control target key start
LH: loop header
LB: loop body
LE: loop exit
PB: predicated region body
PF: predicated region fallthrough
CT: control target
= control target key end

     0   :  { %v140_v0 = vlaneseq  ;;  %v749_v4 = vmov 0.0|0.0   ;;  %vm750_vm0 = vmmov 0   ;;  %v751_v5 = vmov 0.0   ;;  %s1005_s0 = inlined_call_operand.vmem [shape: f32[64,32], index: 0, kind: input, shape index: {}]   ;;  %s1006_s2 = inlined_call_operand.vmem [shape: f32[32,128], index: 2, kind: input, shape index: {}]   ;;  %s1007_s9 = inlined_call_operand.vmem [shape: f32[8,8,128], index: 9, kind: output, shape index: {}]   ;;  %s1008_s4 = inlined_call_operand.vmem [shape: f32[32,128], index: 4, kind: input, shape index: {}]   ;;  %s1009_s6 = inlined_call_operand.vmem [shape: f32[1,128], index: 6, kind: input, shape index: {}]   ;;  %s1010_s7 = inlined_call_operand.vmem [shape: f32[32,128], index: 7, kind: input, shape index: {}]   ;;  %s1011_s8 = inlined_call_operand.vmem [shape: f32[1,128], index: 8, kind: input, shape index: {}]   ;;  %s1012_s3 = inlined_call_operand.vmem [shape: f32[32,128], index: 3, kind: input, shape index: {}]   ;;  %s1013_s1 = inlined_call_operand.vmem [shape: f32[8,32], index: 1, kind: input, shape index: {}]   ;;  %s1014_s5 = inlined_call_operand.vmem [shape: f32[1,128], index: 5, kind: input, shape index: {}]  }
   0x1   :  { %v811_v1 = vld [vmem:[%s1005_s0] sm:$0xff]  ;;  %v816_v2 = vld [vmem:[%s1005_s0 + $0x8] sm:$0xff]  ;;  %v821_v3 = vld [vmem:[%s1005_s0 + $0x10] sm:$0xff]  ;;  %646 = vmatprep.subr.bf16.mxu0 %v749_v4  ;;  %591 = vmatprep.mubr.msk.f32.mxu0 %vm750_vm0, %v751_v5  ;;  %vm66_vm2 = vcmask 261120  }
   0x2   :  { %v826_v6 = vld [vmem:[%s1005_s0 + $0x18] sm:$0xff]  ;;  %v831_v7 = vld [vmem:[%s1005_s0 + $0x20] sm:$0xff]  ;;  %v836_v8 = vld [vmem:[%s1005_s0 + $0x28] sm:$0xff]  ;;  %v838_v9 = vand.u32 127, %v140_v0 }
   0x3   :  { %v843_v10 = vld [vmem:[%s1005_s0 + $0x30] sm:$0xff]  ;;  %v848_v11 = vld [vmem:[%s1005_s0 + $0x38] sm:$0xff]  ;;  %v853_v12 = vld [vmem:[%s1006_s2] sm:$0xff] }
   0x4   :  { %v858_v13 = vld [vmem:[%s1006_s2 + $0x8] sm:$0xff]  ;;  %v863_v14 = vld [vmem:[%s1006_s2 + $0x10] sm:$0xff]  ;;  %v868_v15 = vld [vmem:[%s1006_s2 + $0x18] sm:$0xff]  ;;  %vm142_vm1 = vcmp.eq.s32.totalorder %v838_v9, 0 }
   0x5   :  { %v874_v16 = vld [vmem:[%s1008_s4] sm:$0xff]  ;;  %v879_v17 = vld [vmem:[%s1008_s4 + $0x8] sm:$0xff]  ;;  %v884_v18 = vld [vmem:[%s1008_s4 + $0x10] sm:$0xff]  ;;  %v544_v19 = vsel %vm142_vm1, 1.0, %v751_v5  }
   0x6   :  { %v889_v20 = vld [vmem:[%s1008_s4 + $0x18] sm:$0xff]  ;;  %v894_v21 = vld [vmem:[%s1009_s6] ss:$0 sm:$0xff]  ;;  %v904_v23 = vld [vmem:[%s1010_s7 + $0x8] sm:$0xff] }
   0x7   :  { %v899_v22 = vld [vmem:[%s1010_s7] sm:$0xff]  ;;  %v909_v24 = vld [vmem:[%s1010_s7 + $0x10] sm:$0xff]  ;;  %v914_v25 = vld [vmem:[%s1010_s7 + $0x18] sm:$0xff] }
   0x8   :  { %v919_v26 = vld [vmem:[%s1011_s8] ss:$0 sm:$0xff]  ;;  %v56_v28 = vld [vmem:[%s1012_s3 + $0x8] sm:$0xff]  ;;  %v57_v30 = vld [vmem:[%s1012_s3 + $0x10] sm:$0xff] }
   0x9   :  { %v55_v27 = vld [vmem:[%s1012_s3] sm:$0xff]  ;;  %v58_v31 = vld [vmem:[%s1012_s3 + $0x18] sm:$0xff]  ;;  %s946_s3 = smov 0  }
   0xa   :  { %v647_v29 = vpack.c.bf16 %v56_v28, %v55_v27  ;;  %v650_v32 = vpack.c.bf16 %v58_v31, %v57_v30  ;;  %v32_v33 = vld [vmem:[%s1013_s1] sm:$0xff]  }
   0xb   :  { %v542_v34 = vld [vmem:[%s1014_s5] ss:$0 sm:$0xff] }
   0xc   :  { %648 = vmatpush3.bf16.msra.mxu0 %v647_v29 }
   0xd   :  { %649 = vmatprep.subr.bf16.mxu0 %v749_v4 }
  0x10   :  { %651 = vmatpush3.bf16.msra.mxu0 %v650_v32 }
  0x13   :  { %592 = vmatmul.mubr.msk.f32.vlgmr.msra.gmra.mrb[0].mxu0 %vm66_vm2, %v32_v33 }
  0xe6   :  { %v136_v35 = vpop.f32.mrb[0].mxu0 }
  0xe7   :  { %v940_v36 = vadd.f32 %v542_v34, %v136_v35  ;;  %v593_v37 = vpop.f32.mrb[1].mxu0 }
  0xe8 LB: > { %v653_v38 = vpack.c.bf16 %v816_v2, %v811_v1  ;;  %v752_v39 = vmov 0.0|0.0   ;;  %v656_v40 = vpack.c.bf16 %v826_v6, %v821_v3  ;;  %vm753_vm3 = vmmov 0   ;;  %s755_s1 = smov 64   ;;  %s756_s5 = smov 96   ;;  %s747_s3 = sphi %s946_s3, %s150_s3   ;;  %v743_v33 = vphi %v32_v33, %v416_v33   ;;  %v739_v19 = vphi %v544_v19, %v553_v19  }
  0xe9   : > { %652 = vmatprep.subr.bf16.mxu0 %v752_v39  ;;  %664 = vmatprep.subr.bf16.mxu1 %v752_v39  ;;  %v754_v41 = vmov 0.0   ;;  %v665_v42 = vpack.c.bf16 %v858_v13, %v853_v12  ;;  %v668_v43 = vpack.c.bf16 %v868_v15, %v863_v14  ;;  %v659_v44 = vpack.c.bf16 %v836_v8, %v831_v7  ;;  %s757_s16 = smov 32   ;;  %s552_s2 = sshll.u32 %s747_s3, 3 }
  0xea   : > { %654 = vmatpush3.bf16.msra.mxu0 %v653_v38  ;;  %610 = vmatprep.mubr.msk.f32.mxu0 %vm753_vm3, %v754_v41  ;;  %v662_v45 = vpack.c.bf16 %v848_v11, %v843_v10  ;;  %vm153_vm4 = vcmask 523264   ;;  %v671_v46 = vpack.c.bf16 %v879_v17, %v874_v16  ;;  %v674_v49 = vpack.c.bf16 %v889_v20, %v884_v18  ;;  %s501_s19 = scalar_lea.vmem %s1007_s9, %s552_s2  ;;  %s150_s3 = sadd.s32 1, %s747_s3  }
  0xeb   : > { %655 = vmatprep.subr.bf16.mxu0 %v752_v39  ;;  %621 = vmatprep.mubr.msk.f32.mxu1 %vm753_vm3, %v754_v41  ;;  %v677_v4 = vpack.c.bf16 %v904_v23, %v899_v22  ;;  %v680_v5 = vpack.c.bf16 %v914_v25, %v909_v24  ;;  %p147_p0 = scmp.ge.s32.totalorder %s150_s3, 8  }
  0xec   : > { %666 = vmatpush3.bf16.msra.mxu1 %v665_v42 }
  0xed   : > { %667 = vmatprep.subr.bf16.mxu1 %v752_v39 }
  0xee   : > { %657 = vmatpush3.bf16.msra.mxu0 %v656_v40 }
  0xef   : > { %658 = vmatprep.subr.bf16.mxu0 %v752_v39 }
  0xf0   : > { %669 = vmatpush3.bf16.msra.mxu1 %v668_v43 }
  0xf1   : > { %670 = vmatprep.subr.bf16.mxu1 %v752_v39 }
  0xf2   : > { %660 = vmatpush3.bf16.msra.mxu0 %v659_v44 }
  0xf3   : > { %661 = vmatprep.subr.bf16.mxu0 %v752_v39 }
  0xf6   : > { %663 = vmatpush3.bf16.msra.mxu0 %v662_v45 }
  0xf7   : > { %676 = vmatprep.subr.bf16.mxu0 %v752_v39 }
  0xf9   : > { %611 = vmatmul.mubr.msk.f32.vlgmr.msra.gmra.mrb[0].mxu0 %vm153_vm4, %v739_v19 }
  0xfa   : > { %643 = vmatprep.mubr.msk.f32.mxu0 %vm753_vm3, %v754_v41  ;;  %678 = vmatpush3.bf16.msra.mxu0 %v677_v4 }
  0xfb   : > { %679 = vmatprep.subr.bf16.mxu0 %v752_v39 }
  0xfe   : > { %681 = vmatpush3.bf16.msra.mxu0 %v680_v5 }
 0x1cc   : > { %v223_v47 = vpop.f32.mrb[0].mxu0 }
 0x1cd   : > { %v612_v48 = vpop.f32.mrb[1].mxu0  ;;  %622 = vmatmul.mubr.msk.f32.vlgmr.msra.gmra.mrb[0].mxu1 %vm66_vm2, %v223_v47 }
 0x1ce   : > { %672 = vmatpush3.bf16.msra.mxu1 %v671_v46  ;;  %632 = vmatprep.mubr.msk.f32.mxu1 %vm753_vm3, %v754_v41 }
 0x1cf   : > { %673 = vmatprep.subr.bf16.mxu1 %v752_v39 }
 0x1d2   : > { %675 = vmatpush3.bf16.msra.mxu1 %v674_v49 }
 0x1d5   : > { %633 = vmatmul.mubr.msk.f32.vlgmr.msra.gmra.mrb[2].mxu1 %vm66_vm2, %v743_v33 }
 0x2a0   : > { %v296_v50 = vpop.f32.mrb[0].mxu1 }
 0x2a1   : > { %v623_v51 = vpop.f32.mrb[1].mxu1  ;;  %v297_v55 = vadd.f32 %v296_v50, %v940_v36 }
 0x2a8   : > { %v375_v52 = vpop.f32.mrb[2].mxu1 }
 0x2a9   : > { %v376_v53 = vadd.f32 %v894_v21, %v375_v52  ;;  %v634_v54 = vpop.f32.mrb[3].mxu1 }
 0x2ab   : > { %387 = vrot.lane.b32.xlu0 %v376_v53, %s755_s1  ;;  %v379_v56 = vadd.f32 %v376_v53, %v297_v55 }
 0x2ad   : > { %v549_v57 = vmul.f32 -1.442695, %v379_v56 }
 0x2af   : > { %715 = vpow2.f32 %v549_v57 }
 0x2b9   : > { %v716_v58 = vpop.eup %715 }
 0x2ba   : > { %v383_v59 = vadd.f32 1.0, %v716_v58 }
 0x2bc   : > { %717 = vrcp.f32 %v383_v59 }
 0x2c6   : > { %v718_v60 = vpop.eup %717 }
 0x2c7   : > { %v397_v28 = vsub.f32 1.0, %v718_v60 }
 0x31d   : > { %v388_v61 = vpop.permute.xlu0 %387 }
 0x31e   : > { %v390_v62 = vmul.f32 %v718_v60, %v388_v61 }
 0x320   : > { %392 = vrot.lane.b32.xlu0 %v390_v62, %s755_s1 }
 0x392   : > { %v393_v63 = vpop.permute.xlu0 %392 }
 0x393   : > { %v395_v0 = vadd.f32 %v393_v63, %v297_v55 }
 0x395   : > { %719 = vtanh.f32 %v395_v0 }
 0x39f   : > { %v720_v19 = vpop.eup %719 }
 0x3a0   : > { %399 = vrot.lane.b32.xlu1 %v720_v19, %s756_s5 }
 0x3a4   : > { %403 = vrot.lane.b32.xlu1 %v743_v33, %s757_s16 }
 0x412   : > { %v400_v27 = vpop.permute.xlu1 %399 }
 0x413   : > { %v402_v30 = vmul.f32 %v400_v27, %v397_v28 }
 0x416   : > { %v404_v29 = vpop.permute.xlu1 %403 }
 0x417   : > { %v406_v31 = vmul.f32 %v718_v60, %v404_v29 }
 0x419   : > { %v407_v32 = vadd.f32 %v406_v31, %v402_v30 }
 0x41b   : > { %415 = vrot.lane.b32.xlu0 %v407_v32, %s756_s5 }
 0x48d   : > { %v416_v33 = vpop.permute.xlu0 %415  }
 0x48e   : > { %644 = vmatmul.mubr.msk.f32.vlgmr.msra.gmra.mrb[2].mxu0 %vm66_vm2, %v416_v33 }
 0x561   : > { %v485_v34 = vpop.f32.mrb[2].mxu0 }
 0x562   : > { %v486_v35 = vadd.f32 %v919_v26, %v485_v34  ;;  %v645_v37 = vpop.f32.mrb[3].mxu0 }
 0x564   : > { %489 = vmax.xlane.f32.xlu1 %v486_v35 }
 0x5f1   : > { %v490_v38 = vpop.xlane.xlu1 %489 }
 0x5f2   : > { %v491_v39 = vsub.f32 %v486_v35, %v490_v38 }
 0x5f4   : > { %v492_v40 = vmul.f32 1.442695, %v491_v39 }
 0x5f6   : > { %721 = vpow2.f32 %v492_v40 }
 0x600   : > { %v722_v42 = vpop.eup %721 }
 0x601   : > { %494 = vadd.xlane.f32.xlu0 %v722_v42 }
 0x68e   : > { %v495_v43 = vpop.xlane.xlu0 %494 }
 0x68f   : > { %723 = vlog2.f32 %v495_v43 }
 0x699   : > { %v724_v44 = vpop.eup %723 }
 0x69a   : > { %v497_v45 = vmul.f32 0.6931472, %v724_v44 }
 0x69c   : > { %v498_v46 = vadd.f32 %v497_v45, %v490_v38 }
 0x69e   : > { %v499_v47 = vsub.f32 %v486_v35, %v498_v46 }
 0x6a0   : > { %503 = vmax.xlane.f32.xlu0 %v499_v47  ;;  %502 = vst [vmem:[%s501_s19] sm:$0xff] %v499_v47 }
 0x72d   : > { %v504_v48 = vpop.xlane.xlu0 %503 }
 0x72e   : > { %vm505_vm5 = vcmp.eq.f32.partialorder %v499_v47, %v504_v48 }
 0x72f   : > { %v506_v49 = vsel %vm505_vm5, %v838_v9, 128 }
 0x730   : > { %v508_v50 = vshra.s32 %v506_v49, 16  ;;  %v507_v52 = vand.u32 65535, %v506_v49 }
 0x732   : > { %v510_v51 = vcvt.s32.f32 %v508_v50  ;;  %v509_v53 = vcvt.s32.f32 %v507_v52 }
 0x734   : > { %511 = vmin.xlane.f32.xlu1 %v510_v51 }
 0x7c1   : > { %v512_v54 = vpop.xlane.xlu1 %511 }
 0x7c2   : > { %vm513_vm6 = vcmp.eq.f32.partialorder %v510_v51, %v512_v54  ;;  %v518_v56 = vcvt.f32.s32 %v512_v54 }
 0x7c3   : > { %v514_v55 = vsel %vm513_vm6, %v509_v53, inf }
 0x7c4   : > { %515 = vmin.xlane.f32.xlu0 %v514_v55  ;;  %v519_v58 = vshll.u32 %v518_v56, 16 }
 0x851   : > { %v516_v57 = vpop.xlane.xlu0 %515  ;;  %149 = sbr.rel (!%p147_p0) target bundleno = 232 (0xe8), region = 64 }
 0x852   : > { %v517_v59 = vcvt.f32.s32 %v516_v57 }
 0x854   : > { %v520_v60 = vadd.s32 %v519_v58, %v517_v59 }
 0x856   : > { %vm521_vm7 = vcmp.eq.s32.totalorder %v838_v9, %v520_v60 }
 0x857   : > { %v553_v19 = vsel %vm521_vm7, 1.0, %v754_v41  }

</bundles_post_ra>
